<compile_context>
chip_gen: v5e
topology: v5e:2x2
jax: 0.10.0
libtpu: 0.0.40
codegen_flags: <defaults>
</compile_context>

<pallas_src>
import functools

import jax
import jax.numpy as jnp
from jax.experimental import pallas as pl
from jax.experimental.pallas import tpu as pltpu


def _relpos_kernel(res_i_ref, cid_i_ref, res_j_ref, cid_j_ref, out_ref, *, rmax):
    # res_i_ref / cid_i_ref : (1, TI, 1)    row tile of residue index / chain id
    # res_j_ref / cid_j_ref : (1, 1, TJ)    column tile of residue index / chain id
    # out_ref               : (1, C, TI, TJ) with C = 2*rmax + 1; TJ is the lane axis.
    num_bins = out_ref.shape[1]

    res_i = res_i_ref[0]                      # (TI, 1)
    res_j = res_j_ref[0]                      # (1, TJ)
    same = cid_i_ref[0] == cid_j_ref[0]       # (TI, TJ) via broadcast

    d = jnp.where(
        same,
        jnp.clip(res_i - res_j + float(rmax), 0.0, float(2 * rmax)),
        float(2 * rmax + 1),
    )                                         # (TI, TJ) float32

    # torch.bucketize(d, linspace(0, 2*rmax+1, 2*rmax+2)) - 1, clamped to [0, 2*rmax].
    # Keep it in float; values are small exact integers so float equality below is exact.
    bin_f = jnp.clip(jnp.ceil(d) - 1.0, 0.0, float(2 * rmax))   # (TI, TJ)

    # One-hot as C lane-dense (TI, TJ) slab stores (unmasked vst along the TJ lanes).
    for c in range(num_bins):
        out_ref[0, c] = (bin_f == float(c)).astype(out_ref.dtype)


def _pick_tile(n, target, quantum):
    """Largest divisor of n that is a multiple of `quantum` and <= target, else full n."""
    if n <= target:
        return n
    t = (min(target, n) // quantum) * quantum
    while t >= quantum:
        if n % t == 0:
            return t
        t -= quantum
    return n  # full extent is always (8,128)-legal


def relative_position_encoding(res_index, chain_id, rmax, *,
                               tile_i=128, tile_j=256,
                               out_dtype=None, channels_last=True):
    """res_index, chain_id: (B, N) float32.

    Returns (B, N, N, 2*rmax+1) if channels_last (matches the torch module), otherwise the
    lane-dense kernel layout (B, 2*rmax+1, N, N) for consumers that can take it directly.
    """
    B, N = res_index.shape
    C = 2 * rmax + 1
    out_dtype = res_index.dtype if out_dtype is None else out_dtype

    ti = _pick_tile(N, tile_i, 8)     # sublane-side tile (multiple of 8 or full N)
    tj = _pick_tile(N, tile_j, 128)   # lane-side tile   (multiple of 128 or full N)

    # Present the per-batch 1-D data as row views (B, N, 1) and column views (B, 1, N) so
    # the BlockSpec tiling stays trivially legal; input DMA is negligible either way.
    res_i = res_index[:, :, None]
    cid_i = chain_id[:, :, None]
    res_j = res_index[:, None, :]
    cid_j = chain_id[:, None, :]

    kernel = functools.partial(_relpos_kernel, rmax=rmax)

    out_cfirst = pl.pallas_call(
        kernel,
        out_shape=jax.ShapeDtypeStruct((B, C, N, N), out_dtype),
        grid_spec=pltpu.PrefetchScalarGridSpec(
            num_scalar_prefetch=0,
            grid=(B, N // ti, N // tj),
            in_specs=[
                pl.BlockSpec((1, ti, 1), lambda b, i, j: (b, i, 0)),  # res rows
                pl.BlockSpec((1, ti, 1), lambda b, i, j: (b, i, 0)),  # cid rows
                pl.BlockSpec((1, 1, tj), lambda b, i, j: (b, 0, j)),  # res cols
                pl.BlockSpec((1, 1, tj), lambda b, i, j: (b, 0, j)),  # cid cols
            ],
            out_specs=pl.BlockSpec((1, C, ti, tj), lambda b, i, j: (b, 0, i, j)),
        ),
        compiler_params=pltpu.CompilerParams(
            dimension_semantics=("parallel", "parallel", "parallel"),
            # ~8.5 MiB/out-block at TI=128, TJ=256, C=65, f32; double-buffered ~17 MiB.
            # 48 MiB stays inside v7x's 64 MiB physical VMEM with headroom.
            vmem_limit_bytes=48 * 1024 * 1024,
        ),
    )(res_i, cid_i, res_j, cid_j)

    if channels_last:
        # Layout plumbing only; pass channels_last=False to keep the lane-dense layout
        # (or fuse the downstream projection, which is just a row-gather of its weight).
        return jnp.transpose(out_cfirst, (0, 2, 3, 1))
    return out_cfirst


def _reference(res_index, chain_id, rmax):
    """Pure-JAX reference mirroring the PyTorch forward pass."""
    same = chain_id[..., :, None] == chain_id[..., None, :]
    d = jnp.where(
        same,
        jnp.clip(res_index[..., :, None] - res_index[..., None, :] + rmax, 0, 2 * rmax),
        float(2 * rmax + 1),
    )
    bin_idx = jnp.clip(jnp.ceil(d) - 1, 0, 2 * rmax).astype(jnp.int32)
    return jax.nn.one_hot(bin_idx, 2 * rmax + 1, dtype=res_index.dtype)


if __name__ == "__main__":
    rmax = 4                      # module hyper-parameter (no learned weights)
    key = jax.random.PRNGKey(0)
    k1, k2, k3, k4 = jax.random.split(key, 4)

    # Small shape (single tile per axis).
    B, N = 2, 16
    res_index = jax.random.randint(k1, (B, N), 0, 40).astype(jnp.float32)
    chain_id = jax.random.randint(k2, (B, N), 0, 3).astype(jnp.float32)

    out = relative_position_encoding(res_index, chain_id, rmax)
    out = jax.block_until_ready(out)
    ref = _reference(res_index, chain_id, rmax)
    assert out.shape == (B, N, N, 2 * rmax + 1)
    assert out.dtype == jnp.float32
    assert jnp.array_equal(out, ref)

    # Slightly larger shape exercising the multi-tile (i, j) grid path.
    B2, N2 = 1, 256
    res_index2 = jax.random.randint(k3, (B2, N2), 0, 300).astype(jnp.float32)
    chain_id2 = jax.random.randint(k4, (B2, N2), 0, 4).astype(jnp.float32)

    out2 = relative_position_encoding(res_index2, chain_id2, rmax)
    out2 = jax.block_until_ready(out2)
    ref2 = _reference(res_index2, chain_id2, rmax)
    assert out2.shape == (B2, N2, N2, 2 * rmax + 1)
    assert jnp.array_equal(out2, ref2)

    print("KERNEL_OK")
</pallas_src>

<mosaic_0001>
module attributes {stable_mosaic.version = 11 : i64} {
  func.func @_relpos_kernel(%arg0: i32, %arg1: i32, %arg2: i32, %arg3: memref<1x16x1xf32, #tpu.memory_space<vmem>>, %arg4: memref<1x16x1xf32, #tpu.memory_space<vmem>>, %arg5: memref<1x1x16xf32, #tpu.memory_space<vmem>>, %arg6: memref<1x1x16xf32, #tpu.memory_space<vmem>>, %arg7: memref<1x9x16x16xf32, #tpu.memory_space<vmem>>) attributes {dimension_semantics = [#tpu.dimension_semantics<parallel>, #tpu.dimension_semantics<parallel>, #tpu.dimension_semantics<parallel>], iteration_bounds = array<i64: 2, 1, 1>, scalar_prefetch = 0 : i64, scratch_operands = 0 : i64, tpu.core_type = #tpu.core_type<tc>, window_params = [{transform_indices = @transform_0, window_bounds = array<i64: 1, 16, 1>}, {transform_indices = @transform_1, window_bounds = array<i64: 1, 16, 1>}, {transform_indices = @transform_2, window_bounds = array<i64: 1, 1, 16>}, {transform_indices = @transform_3, window_bounds = array<i64: 1, 1, 16>}, {transform_indices = @transform_4, window_bounds = array<i64: 1, 9, 16, 16>}]} {
    %c0 = arith.constant 0 : index
    %c0_0 = arith.constant 0 : index
    %c0_1 = arith.constant 0 : index
    %0 = vector.load %arg3[%c0, %c0_0, %c0_1] : memref<1x16x1xf32, #tpu.memory_space<vmem>>, vector<1x16x1xf32>
    %1 = vector.shape_cast %0 : vector<1x16x1xf32> to vector<16x1xf32>
    %c0_2 = arith.constant 0 : index
    %c0_3 = arith.constant 0 : index
    %c0_4 = arith.constant 0 : index
    %2 = vector.load %arg5[%c0_2, %c0_3, %c0_4] : memref<1x1x16xf32, #tpu.memory_space<vmem>>, vector<1x1x16xf32>
    %3 = vector.shape_cast %2 : vector<1x1x16xf32> to vector<1x16xf32>
    %c0_5 = arith.constant 0 : index
    %c0_6 = arith.constant 0 : index
    %c0_7 = arith.constant 0 : index
    %4 = vector.load %arg4[%c0_5, %c0_6, %c0_7] : memref<1x16x1xf32, #tpu.memory_space<vmem>>, vector<1x16x1xf32>
    %5 = vector.shape_cast %4 : vector<1x16x1xf32> to vector<16x1xf32>
    %c0_8 = arith.constant 0 : index
    %c0_9 = arith.constant 0 : index
    %c0_10 = arith.constant 0 : index
    %6 = vector.load %arg6[%c0_8, %c0_9, %c0_10] : memref<1x1x16xf32, #tpu.memory_space<vmem>>, vector<1x1x16xf32>
    %7 = vector.shape_cast %6 : vector<1x1x16xf32> to vector<1x16xf32>
    %8 = vector.broadcast %5 : vector<16x1xf32> to vector<16x16xf32>
    %9 = vector.broadcast %7 : vector<1x16xf32> to vector<16x16xf32>
    %10 = arith.cmpf oeq, %8, %9 : vector<16x16xf32>
    %11 = vector.broadcast %1 : vector<16x1xf32> to vector<16x16xf32>
    %12 = vector.broadcast %3 : vector<1x16xf32> to vector<16x16xf32>
    %13 = arith.subf %11, %12 : vector<16x16xf32>
    %cst = arith.constant 4.000000e+00 : f32
    %14 = vector.broadcast %cst : f32 to vector<16x16xf32>
    %15 = arith.addf %13, %14 : vector<16x16xf32>
    %cst_11 = arith.constant 0.000000e+00 : f32
    %cst_12 = arith.constant 8.000000e+00 : f32
    %16 = vector.broadcast %cst_11 : f32 to vector<16x16xf32>
    %17 = arith.maximumf %16, %15 : vector<16x16xf32>
    %18 = vector.broadcast %cst_12 : f32 to vector<16x16xf32>
    %19 = arith.minimumf %18, %17 : vector<16x16xf32>
    %cst_13 = arith.constant 9.000000e+00 : f32
    %20 = vector.broadcast %cst_13 : f32 to vector<16x16xf32>
    %21 = arith.select %10, %19, %20 : vector<16x16xi1>, vector<16x16xf32>
    %22 = math.ceil %21 : vector<16x16xf32>
    %cst_14 = arith.constant 1.000000e+00 : f32
    %23 = vector.broadcast %cst_14 : f32 to vector<16x16xf32>
    %24 = arith.subf %22, %23 : vector<16x16xf32>
    %cst_15 = arith.constant 0.000000e+00 : f32
    %cst_16 = arith.constant 8.000000e+00 : f32
    %25 = vector.broadcast %cst_15 : f32 to vector<16x16xf32>
    %26 = arith.maximumf %25, %24 : vector<16x16xf32>
    %27 = vector.broadcast %cst_16 : f32 to vector<16x16xf32>
    %28 = arith.minimumf %27, %26 : vector<16x16xf32>
    %cst_17 = arith.constant 0.000000e+00 : f32
    %29 = vector.broadcast %cst_17 : f32 to vector<16x16xf32>
    %30 = arith.cmpf oeq, %28, %29 : vector<16x16xf32>
    %31 = arith.extui %30 : vector<16x16xi1> to vector<16x16xi32>
    %32 = arith.sitofp %31 : vector<16x16xi32> to vector<16x16xf32>
    %c0_18 = arith.constant 0 : index
    %c0_19 = arith.constant 0 : index
    %c0_20 = arith.constant 0 : index
    %c0_21 = arith.constant 0 : index
    %33 = vector.load %arg7[%c0_18, %c0_19, %c0_20, %c0_21] : memref<1x9x16x16xf32, #tpu.memory_space<vmem>>, vector<1x1x16x16xf32>
    %34 = vector.shape_cast %33 : vector<1x1x16x16xf32> to vector<16x16xf32>
    %35 = vector.shape_cast %32 : vector<16x16xf32> to vector<1x1x16x16xf32>
    tpu.vector_store %arg7[%c0_18, %c0_19, %c0_20, %c0_21], %35 {strides = array<i32>} : memref<1x9x16x16xf32, #tpu.memory_space<vmem>>, vector<1x1x16x16xf32>,
    %cst_22 = arith.constant 1.000000e+00 : f32
    %36 = vector.broadcast %cst_22 : f32 to vector<16x16xf32>
    %37 = arith.cmpf oeq, %28, %36 : vector<16x16xf32>
    %38 = arith.extui %37 : vector<16x16xi1> to vector<16x16xi32>
    %39 = arith.sitofp %38 : vector<16x16xi32> to vector<16x16xf32>
    %c0_23 = arith.constant 0 : index
    %c1 = arith.constant 1 : index
    %c0_24 = arith.constant 0 : index
    %c0_25 = arith.constant 0 : index
    %40 = vector.load %arg7[%c0_23, %c1, %c0_24, %c0_25] : memref<1x9x16x16xf32, #tpu.memory_space<vmem>>, vector<1x1x16x16xf32>
    %41 = vector.shape_cast %40 : vector<1x1x16x16xf32> to vector<16x16xf32>
    %42 = vector.shape_cast %39 : vector<16x16xf32> to vector<1x1x16x16xf32>
    tpu.vector_store %arg7[%c0_23, %c1, %c0_24, %c0_25], %42 {strides = array<i32>} : memref<1x9x16x16xf32, #tpu.memory_space<vmem>>, vector<1x1x16x16xf32>,
    %cst_26 = arith.constant 2.000000e+00 : f32
    %43 = vector.broadcast %cst_26 : f32 to vector<16x16xf32>
    %44 = arith.cmpf oeq, %28, %43 : vector<16x16xf32>
    %45 = arith.extui %44 : vector<16x16xi1> to vector<16x16xi32>
    %46 = arith.sitofp %45 : vector<16x16xi32> to vector<16x16xf32>
    %c0_27 = arith.constant 0 : index
    %c2 = arith.constant 2 : index
    %c0_28 = arith.constant 0 : index
    %c0_29 = arith.constant 0 : index
    %47 = vector.load %arg7[%c0_27, %c2, %c0_28, %c0_29] : memref<1x9x16x16xf32, #tpu.memory_space<vmem>>, vector<1x1x16x16xf32>
    %48 = vector.shape_cast %47 : vector<1x1x16x16xf32> to vector<16x16xf32>
    %49 = vector.shape_cast %46 : vector<16x16xf32> to vector<1x1x16x16xf32>
    tpu.vector_store %arg7[%c0_27, %c2, %c0_28, %c0_29], %49 {strides = array<i32>} : memref<1x9x16x16xf32, #tpu.memory_space<vmem>>, vector<1x1x16x16xf32>,
    %cst_30 = arith.constant 3.000000e+00 : f32
    %50 = vector.broadcast %cst_30 : f32 to vector<16x16xf32>
    %51 = arith.cmpf oeq, %28, %50 : vector<16x16xf32>
    %52 = arith.extui %51 : vector<16x16xi1> to vector<16x16xi32>
    %53 = arith.sitofp %52 : vector<16x16xi32> to vector<16x16xf32>
    %c0_31 = arith.constant 0 : index
    %c3 = arith.constant 3 : index
    %c0_32 = arith.constant 0 : index
    %c0_33 = arith.constant 0 : index
    %54 = vector.load %arg7[%c0_31, %c3, %c0_32, %c0_33] : memref<1x9x16x16xf32, #tpu.memory_space<vmem>>, vector<1x1x16x16xf32>
    %55 = vector.shape_cast %54 : vector<1x1x16x16xf32> to vector<16x16xf32>
    %56 = vector.shape_cast %53 : vector<16x16xf32> to vector<1x1x16x16xf32>
    tpu.vector_store %arg7[%c0_31, %c3, %c0_32, %c0_33], %56 {strides = array<i32>} : memref<1x9x16x16xf32, #tpu.memory_space<vmem>>, vector<1x1x16x16xf32>,
    %cst_34 = arith.constant 4.000000e+00 : f32
    %57 = vector.broadcast %cst_34 : f32 to vector<16x16xf32>
    %58 = arith.cmpf oeq, %28, %57 : vector<16x16xf32>
    %59 = arith.extui %58 : vector<16x16xi1> to vector<16x16xi32>
    %60 = arith.sitofp %59 : vector<16x16xi32> to vector<16x16xf32>
    %c0_35 = arith.constant 0 : index
    %c4 = arith.constant 4 : index
    %c0_36 = arith.constant 0 : index
    %c0_37 = arith.constant 0 : index
    %61 = vector.load %arg7[%c0_35, %c4, %c0_36, %c0_37] : memref<1x9x16x16xf32, #tpu.memory_space<vmem>>, vector<1x1x16x16xf32>
    %62 = vector.shape_cast %61 : vector<1x1x16x16xf32> to vector<16x16xf32>
    %63 = vector.shape_cast %60 : vector<16x16xf32> to vector<1x1x16x16xf32>
    tpu.vector_store %arg7[%c0_35, %c4, %c0_36, %c0_37], %63 {strides = array<i32>} : memref<1x9x16x16xf32, #tpu.memory_space<vmem>>, vector<1x1x16x16xf32>,
    %cst_38 = arith.constant 5.000000e+00 : f32
    %64 = vector.broadcast %cst_38 : f32 to vector<16x16xf32>
    %65 = arith.cmpf oeq, %28, %64 : vector<16x16xf32>
    %66 = arith.extui %65 : vector<16x16xi1> to vector<16x16xi32>
    %67 = arith.sitofp %66 : vector<16x16xi32> to vector<16x16xf32>
    %c0_39 = arith.constant 0 : index
    %c5 = arith.constant 5 : index
    %c0_40 = arith.constant 0 : index
    %c0_41 = arith.constant 0 : index
    %68 = vector.load %arg7[%c0_39, %c5, %c0_40, %c0_41] : memref<1x9x16x16xf32, #tpu.memory_space<vmem>>, vector<1x1x16x16xf32>
    %69 = vector.shape_cast %68 : vector<1x1x16x16xf32> to vector<16x16xf32>
    %70 = vector.shape_cast %67 : vector<16x16xf32> to vector<1x1x16x16xf32>
    tpu.vector_store %arg7[%c0_39, %c5, %c0_40, %c0_41], %70 {strides = array<i32>} : memref<1x9x16x16xf32, #tpu.memory_space<vmem>>, vector<1x1x16x16xf32>,
    %cst_42 = arith.constant 6.000000e+00 : f32
    %71 = vector.broadcast %cst_42 : f32 to vector<16x16xf32>
    %72 = arith.cmpf oeq, %28, %71 : vector<16x16xf32>
    %73 = arith.extui %72 : vector<16x16xi1> to vector<16x16xi32>
    %74 = arith.sitofp %73 : vector<16x16xi32> to vector<16x16xf32>
    %c0_43 = arith.constant 0 : index
    %c6 = arith.constant 6 : index
    %c0_44 = arith.constant 0 : index
    %c0_45 = arith.constant 0 : index
    %75 = vector.load %arg7[%c0_43, %c6, %c0_44, %c0_45] : memref<1x9x16x16xf32, #tpu.memory_space<vmem>>, vector<1x1x16x16xf32>
    %76 = vector.shape_cast %75 : vector<1x1x16x16xf32> to vector<16x16xf32>
    %77 = vector.shape_cast %74 : vector<16x16xf32> to vector<1x1x16x16xf32>
    tpu.vector_store %arg7[%c0_43, %c6, %c0_44, %c0_45], %77 {strides = array<i32>} : memref<1x9x16x16xf32, #tpu.memory_space<vmem>>, vector<1x1x16x16xf32>,
    %cst_46 = arith.constant 7.000000e+00 : f32
    %78 = vector.broadcast %cst_46 : f32 to vector<16x16xf32>
    %79 = arith.cmpf oeq, %28, %78 : vector<16x16xf32>
    %80 = arith.extui %79 : vector<16x16xi1> to vector<16x16xi32>
    %81 = arith.sitofp %80 : vector<16x16xi32> to vector<16x16xf32>
    %c0_47 = arith.constant 0 : index
    %c7 = arith.constant 7 : index
    %c0_48 = arith.constant 0 : index
    %c0_49 = arith.constant 0 : index
    %82 = vector.load %arg7[%c0_47, %c7, %c0_48, %c0_49] : memref<1x9x16x16xf32, #tpu.memory_space<vmem>>, vector<1x1x16x16xf32>
    %83 = vector.shape_cast %82 : vector<1x1x16x16xf32> to vector<16x16xf32>
    %84 = vector.shape_cast %81 : vector<16x16xf32> to vector<1x1x16x16xf32>
    tpu.vector_store %arg7[%c0_47, %c7, %c0_48, %c0_49], %84 {strides = array<i32>} : memref<1x9x16x16xf32, #tpu.memory_space<vmem>>, vector<1x1x16x16xf32>,
    %cst_50 = arith.constant 8.000000e+00 : f32
    %85 = vector.broadcast %cst_50 : f32 to vector<16x16xf32>
    %86 = arith.cmpf oeq, %28, %85 : vector<16x16xf32>
    %87 = arith.extui %86 : vector<16x16xi1> to vector<16x16xi32>
    %88 = arith.sitofp %87 : vector<16x16xi32> to vector<16x16xf32>
    %c0_51 = arith.constant 0 : index
    %c8 = arith.constant 8 : index
    %c0_52 = arith.constant 0 : index
    %c0_53 = arith.constant 0 : index
    %89 = vector.load %arg7[%c0_51, %c8, %c0_52, %c0_53] : memref<1x9x16x16xf32, #tpu.memory_space<vmem>>, vector<1x1x16x16xf32>
    %90 = vector.shape_cast %89 : vector<1x1x16x16xf32> to vector<16x16xf32>
    %91 = vector.shape_cast %88 : vector<16x16xf32> to vector<1x1x16x16xf32>
    tpu.vector_store %arg7[%c0_51, %c8, %c0_52, %c0_53], %91 {strides = array<i32>} : memref<1x9x16x16xf32, #tpu.memory_space<vmem>>, vector<1x1x16x16xf32>,
    return
  }
  func.func @transform_0(%arg0: i32, %arg1: i32, %arg2: i32) -> (i32, i32, i32) {
    %c0_i32 = arith.constant 0 : i32
    %c0_i32_0 = arith.constant 0 : i32
    return %arg0, %arg1, %c0_i32 : i32, i32, i32
  }
  func.func @transform_1(%arg0: i32, %arg1: i32, %arg2: i32) -> (i32, i32, i32) {
    %c0_i32 = arith.constant 0 : i32
    %c0_i32_0 = arith.constant 0 : i32
    return %arg0, %arg1, %c0_i32 : i32, i32, i32
  }
  func.func @transform_2(%arg0: i32, %arg1: i32, %arg2: i32) -> (i32, i32, i32) {
    %c0_i32 = arith.constant 0 : i32
    %c0_i32_0 = arith.constant 0 : i32
    return %arg0, %c0_i32, %arg2 : i32, i32, i32
  }
  func.func @transform_3(%arg0: i32, %arg1: i32, %arg2: i32) -> (i32, i32, i32) {
    %c0_i32 = arith.constant 0 : i32
    %c0_i32_0 = arith.constant 0 : i32
    return %arg0, %c0_i32, %arg2 : i32, i32, i32
  }
  func.func @transform_4(%arg0: i32, %arg1: i32, %arg2: i32) -> (i32, i32, i32, i32) {
    %c0_i32 = arith.constant 0 : i32
    %c0_i32_0 = arith.constant 0 : i32
    return %arg0, %c0_i32, %arg1, %arg2 : i32, i32, i32, i32
  }
}

</mosaic_0001>

<bundles_post_ra>
// kernel: tpu_custom_call.1
= control target key start
LH: loop header
LB: loop body
LE: loop exit
PB: predicated region body
PF: predicated region fallthrough
CT: control target
= control target key end

     0   :  { %9 = vsyncpa [#allocation3], 0  ;;  %s972_s0 = inlined_call_operand.vmem [shape: f32[2,16,1], index: 0, kind: input, shape index: {}]   ;;  %s973_s1 = inlined_call_operand.vmem [shape: f32[2,16,1], index: 1, kind: input, shape index: {}]   ;;  %s974_s2 = inlined_call_operand.vmem [shape: f32[2,1,16], index: 2, kind: input, shape index: {}]   ;;  %s975_s3 = inlined_call_operand.vmem [shape: f32[2,1,16], index: 3, kind: input, shape index: {}]   ;;  %s976_s4 = inlined_call_operand.hbm [shape: f32[2,9,16,16], index: 4, kind: output, shape index: {}]  }
   0x1   :  { %11 = vsyncpa [#allocation3 + $0x1], 0  ;;  %s823_s15 = smov 0   ;;  %s825_s16 = smov 0  }
   0x2   :  { %s827_s17 = smov 0   ;;  %s829_s18 = smov 0  }
   0x3   :  { %s831_s19 = smov 0   ;;  %s833_s20 = smov 0  }
   0x4 LB: > { %s599_s21 = sadd.s32 4294967295, %s792_s20   ;;  %s600_s22 = sadd.s32 4294967294, %s792_s20   ;;  %s792_s20 = sphi %s833_s20, %s17_s20   ;;  %s788_s19 = sphi %s831_s19, %s983_s19   ;;  %s784_s18 = sphi %s829_s18, %s982_s18   ;;  %s780_s17 = sphi %s827_s17, %s981_s17   ;;  %s776_s16 = sphi %s825_s16, %s980_s16   ;;  %s772_s15 = sphi %s823_s15, %s979_s15  }
   0x5   : > { %s36_s23 = sadd.s32 1, %s788_s19  ;;  %s159_s24 = sadd.s32 1, %s780_s17 }
   0x6   : > { %p38_p0 = scmp.ge.s32.totalorder %s36_s23, 2  ;;  %p169_p1 = scmp.ne.s32.totalorder %s780_s17, %s776_s16 }
   0x7   : > { %p170_p2 = scmp.eq.s32.totalorder %s599_s21, 1  ;;  %p175_p3 = scmp.ne.s32.totalorder %s776_s16, %s772_s15 }
   0x8   : > { %s985_s23 = smov (%p38_p0, %s36_s23), 0  ;;  %p176_p5 = scmp.eq.s32.totalorder %s600_s22, 1 }
   0x9   : > { %p863_p4 = por %p170_p2, %p169_p1  ;;  %s152_s26 = ssub.s32 %s788_s19, %s985_s23 }
   0xa   : > { %p603_p6 = scmp.ge.s32.totalorder %s792_s20, 1  ;;  %p157_p7 = scmp.eq.s32.totalorder %s152_s26, 0 }
   0xb   : > { %p870_p8 = por %p176_p5, %p175_p3  ;;  %p238_p9 = scmp.lt.s32.totalorder %s792_s20, 3 }
   0xc   : > { %s876_s28 = scalar_select %p157_p7, %s780_s17, %s159_s24  }
   0xd   : > { %p239_p10 = pnand %p603_p6, %p238_p9 }
   0xe   : > { %p290_p11 = scmp.lt.s32.totalorder (!%p239_p10), %s784_s18, 1  ;;  %s286_s24 = sand.u32 (!%p239_p10), 1, %s776_s16  }
   0xf   : > { %242 = sbr.rel (%p239_p10) target bundleno = 183 (0xb7), region = 36  ;;  %s456_s9 = scalar_lea.sflag (!%p239_p10), [#allocation3], %s286_s24 }
  0x10   : > { %s649_s26 = smul.u32 (!%p239_p10), 144, %s286_s24  ;;  %s734_s14 = scalar_lea.hbm (!%p239_p10), %s976_s4, 288 }
  0x14   : > { %v794_v0 = vmov 0   ;;  %s291_s29 = scalar_select %p290_p11, %s784_s18, 1  ;;  %vm380_vm1 = vcmask 130048   ;;  %v795_v24 = vmov 0.0  }
  0x15   : > { %711 = vset.pattern.permute.xlu1 %v794_v0  ;;  %710 = vset.pattern.permute.xlu0 %v794_v0 }
  0x16   : > { %s647_s30 = sshll.u32 %s291_s29, 4  ;;  %s320_s7 = scalar_lea.vmem %s975_s3, %s291_s29 }
  0x17   : > { %s307_s10 = scalar_lea.vmem %s973_s1, %s647_s30  ;;  %s297_s13 = scalar_lea.vmem %s972_s0, %s647_s30  ;;  %v712_v8 = vld [vmem:[%s320_s7] ss:$0 sm:$0xff] }
  0x18   : > { %v325_v1 = vld [vmem:[%s307_s10] sm:$0xff]  ;;  %s314_s22 = scalar_lea.vmem %s974_s2, %s291_s29  ;;  %v326_v3 = vld [vmem:[%s307_s10 + $0x8] sm:$0xff]  ;;  %s895_s29 = scalar_lea.vmem [#allocation2], %s649_s26 }
  0x19   : > { %v322_v2 = vld [vmem:[%s297_s13] sm:$0xff]  ;;  %330 = vperm.xlu1 %711, %v325_v1   ;;  %v323_v4 = vld [vmem:[%s297_s13 + $0x8] sm:$0xff]  ;;  %s650_s30 = smul.u32 144, %s784_s18  ;;  %s471_s18 = sshll.u32 %s895_s29, 4  ;;  %s472_s18 = int_to_ptr.vmem [resolvable:$true] %s471_s18 }
  0x1a   : > { %345 = vperm.xlu0 %710, %v322_v2   ;;  %v713_v5 = vld [vmem:[%s314_s22] ss:$0 sm:$0xff] }
  0x1b   : > { %s470_s7 = scalar_lea.hbm %s976_s4, %s650_s30 }
  0x1c   : > { %s473_s8 = sshll.u32 %s470_s7, 4  ;;  %s474_s8 = int_to_ptr.hbm [resolvable:$true] %s473_s8 }
  0x1d   : > { %s728_s10 = sshra.s32 %s474_s8, 4  ;;  %s729_s10 = int_to_ptr.hbm [resolvable:$true] %s728_s10 }
  0x1e   : > { %s730_s11 = scalar_lea.hbm %s729_s10, 144  ;;  %p735_p1 = scmp.lt.s32.totalorder %s729_s10, %s976_s4 }
  0x1f   : > { %p731_p12 = scmp.ne.s32.totalorder %s729_s10, %s730_s11  ;;  %p736_p2 = scmp.lt.s32.totalorder %s734_s14, %s730_s11 }
  0x21   : > { %335 = vperm.xlu1 %711, %v326_v3   ;;  %p732_p13 = pnand %p731_p12, %p863_p4  ;;  %p737_p3 = por %p736_p2, %p735_p1 }
  0x22   : > { %350 = vperm.xlu0 %710, %v323_v4  }
  0x23   : > { %p733_p0 = pneg %p732_p13 }
  0x25   : > { %p738_p5 = pnand %p737_p3, %p733_p0 }
  0x8b   : > { %v331_v10 = vpop.permute.xlu1 %330 }
  0x8c   : > { %v346_v6 = vpop.permute.xlu0 %345  ;;  %vm341_vm0 = vcmp.eq.f32.partialorder %v331_v10, %v712_v8 }
  0x8d   : > { %v356_v7 = vsub.f32 %v346_v6, %v713_v5 }
  0x8f   : > { %v358_v9 = vadd.f32 4.0, %v356_v7 }
  0x91   : > { %v360_v11 = vmax.f32 %v358_v9, 0.0 }
  0x93   : > { %v362_v12 = vmin.f32 %v360_v11, 8.0  ;;  %v336_v21 = vpop.permute.xlu1 %335 }
  0x94   : > { %v351_v13 = vpop.permute.xlu0 %350  ;;  %vm342_vm2 = vcmp.eq.f32.partialorder %v336_v21, %v712_v8 }
  0x95   : > { %v364_v14 = vsel %vm341_vm0, %v362_v12, 9.0  ;;  %v357_v15 = vsub.f32 %v351_v13, %v713_v5 }
  0x96   : > { %v366_v16 = vceil.f32 %v364_v14 }
  0x97   : > { %v359_v17 = vadd.f32 4.0, %v357_v15 }
  0x98   : > { %v608_v18 = vadd.f32 -1.0, %v366_v16 }
  0x99   : > { %v361_v19 = vmax.f32 %v359_v17, 0.0 }
  0x9a   : > { %v370_v20 = vmax.f32 %v608_v18, 0.0 }
  0x9b   : > { %v363_v22 = vmin.f32 %v361_v19, 8.0 }
  0x9c   : > { %v372_v23 = vmin.f32 %v370_v20, 8.0 }
  0x9d   : > { %v365_v28 = vsel %vm342_vm2, %v363_v22, 9.0 }
  0x9e   : > { %vm374_vm3 = vcmp.eq.f32.partialorder %v372_v23, 0.0  ;;  %vm383_vm4 = vcmp.eq.f32.partialorder %v372_v23, 1.0  ;;  %vm392_vm5 = vcmp.eq.f32.partialorder %v372_v23, 2.0  ;;  %vm401_vm6 = vcmp.eq.f32.partialorder %v372_v23, 3.0 }
  0x9f   : > { %v610_v25 = vsel %vm374_vm3, 1.0, %v795_v24  ;;  %v612_v26 = vsel %vm383_vm4, 1.0, %v795_v24  ;;  %v616_v27 = vsel %vm392_vm5, 1.0, %v795_v24  ;;  %v620_v29 = vsel %vm401_vm6, 1.0, %v795_v24 }
  0xa0   : > { %381 = vst.msk [vmem:[%s895_s29] sm:$0xff] %vm380_vm1, %v610_v25  ;;  %vm410_vm7 = vcmp.eq.f32.partialorder %v372_v23, 4.0  ;;  %vm419_vm8 = vcmp.eq.f32.partialorder %v372_v23, 5.0  ;;  %vm428_vm9 = vcmp.eq.f32.partialorder %v372_v23, 6.0  ;;  %vm437_vm10 = vcmp.eq.f32.partialorder %v372_v23, 7.0 }
  0xa1   : > { %614 = vst.msk [vmem:[%s895_s29 + $0x10] sm:$0xff] %vm380_vm1, %v612_v26  ;;  %v624_v30 = vsel %vm410_vm7, 1.0, %v795_v24  ;;  %v628_v31 = vsel %vm419_vm8, 1.0, %v795_v24  ;;  %vm446_vm11 = vcmp.eq.f32.partialorder %v372_v23, 8.0  ;;  %v367_v32 = vceil.f32 %v365_v28 }
  0xa2   : > { %618 = vst.msk [vmem:[%s895_s29 + $0x20] sm:$0xff] %vm380_vm1, %v616_v27  ;;  %v632_v33 = vsel %vm428_vm9, 1.0, %v795_v24  ;;  %v636_v34 = vsel %vm437_vm10, 1.0, %v795_v24  ;;  %v640_v36 = vsel %vm446_vm11, 1.0, %v795_v24 }
  0xa3   : > { %622 = vst.msk [vmem:[%s895_s29 + $0x30] sm:$0xff] %vm380_vm1, %v620_v29  ;;  %v609_v35 = vadd.f32 -1.0, %v367_v32 }
  0xa4   : > { %626 = vst.msk [vmem:[%s895_s29 + $0x40] sm:$0xff] %vm380_vm1, %v624_v30 }
  0xa5   : > { %630 = vst.msk [vmem:[%s895_s29 + $0x50] sm:$0xff] %vm380_vm1, %v628_v31  ;;  %v371_v37 = vmax.f32 %v609_v35, 0.0 }
  0xa6   : > { %634 = vst.msk [vmem:[%s895_s29 + $0x60] sm:$0xff] %vm380_vm1, %v632_v33 }
  0xa7   : > { %638 = vst.msk [vmem:[%s895_s29 + $0x70] sm:$0xff] %vm380_vm1, %v636_v34  ;;  %v373_v38 = vmin.f32 %v371_v37, 8.0 }
  0xa8   : > { %642 = vst.msk [vmem:[%s895_s29 + $0x80] sm:$0xff] %vm380_vm1, %v640_v36 }
  0xa9   : > { %vm375_vm12 = vcmp.eq.f32.partialorder %v373_v38, 0.0  ;;  %vm384_vm13 = vcmp.eq.f32.partialorder %v373_v38, 1.0  ;;  %vm393_vm14 = vcmp.eq.f32.partialorder %v373_v38, 2.0  ;;  %vm402_vm15 = vcmp.eq.f32.partialorder %v373_v38, 3.0 }
  0xaa   : > { %v611_v39 = vsel %vm375_vm12, 1.0, %v795_v24  ;;  %v613_v40 = vsel %vm384_vm13, 1.0, %v795_v24  ;;  %v617_v41 = vsel %vm393_vm14, 1.0, %v795_v24  ;;  %v621_v42 = vsel %vm402_vm15, 1.0, %v795_v24 }
  0xab   : > { %382 = vst.msk [vmem:[%s895_s29 + $0x8] sm:$0xff] %vm380_vm1, %v611_v39  ;;  %vm411_vm0 = vcmp.eq.f32.partialorder %v373_v38, 4.0  ;;  %vm420_vm2 = vcmp.eq.f32.partialorder %v373_v38, 5.0  ;;  %vm429_vm3 = vcmp.eq.f32.partialorder %v373_v38, 6.0  ;;  %vm438_vm4 = vcmp.eq.f32.partialorder %v373_v38, 7.0 }
  0xac   : > { %615 = vst.msk [vmem:[%s895_s29 + $0x18] sm:$0xff] %vm380_vm1, %v613_v40  ;;  %v625_v43 = vsel %vm411_vm0, 1.0, %v795_v24  ;;  %v629_v44 = vsel %vm420_vm2, 1.0, %v795_v24  ;;  %vm447_vm5 = vcmp.eq.f32.partialorder %v373_v38, 8.0  ;;  %v633_v45 = vsel %vm429_vm3, 1.0, %v795_v24 }
  0xad   : > { %619 = vst.msk [vmem:[%s895_s29 + $0x28] sm:$0xff] %vm380_vm1, %v617_v41  ;;  %v637_v46 = vsel %vm438_vm4, 1.0, %v795_v24  ;;  %v641_v47 = vsel %vm447_vm5, 1.0, %v795_v24 }
  0xae   : > { %623 = vst.msk [vmem:[%s895_s29 + $0x38] sm:$0xff] %vm380_vm1, %v621_v42 }
  0xaf   : > { %627 = vst.msk [vmem:[%s895_s29 + $0x48] sm:$0xff] %vm380_vm1, %v625_v43 }
  0xb0   : > { %631 = vst.msk [vmem:[%s895_s29 + $0x58] sm:$0xff] %vm380_vm1, %v629_v44 }
  0xb1   : > { %635 = vst.msk [vmem:[%s895_s29 + $0x68] sm:$0xff] %vm380_vm1, %v633_v45 }
  0xb2   : > { %639 = vst.msk [vmem:[%s895_s29 + $0x78] sm:$0xff] %vm380_vm1, %v637_v46 }
  0xb3   : > { %643 = vst.msk [vmem:[%s895_s29 + $0x88] sm:$0xff] %vm380_vm1, %v641_v47 }
  0xb4   : > { %741 = shalt.err (!%p738_p5)
}
  0xb5   : > { %s796_s24 = smov 128   ;;  %s797_s26 = smov 8  }
  0xb6   : > { %651 = dma.vmem_to_hbm [thread:$0]  (%p863_p4), %s472_s18, 2304, %s474_s8, %s456_s9, %s796_s24, %s796_s24, %s797_s26  }
  0xb7 PF: > { %p657_p6 = scmp.ge.s32.totalorder %s792_s20, 2  ;;  %s488_s29 = sand.u32 1, %s772_s15  }
  0xb8   : > { %s489_s30 = scalar_lea.sflag [#allocation3], %s488_s29 }
  0xb9   : > { %p654_p7 = pnand %p657_p6, %p870_p8 }
  0xbb   : > { %p655_p9 = pneg %p654_p7 }
  0xbd   : > { %767 = dma.done.wait (%p655_p9), %s489_s30, 2304  }
  0xbe   : > { %769 = vsyncadd (%p655_p9), %s489_s30, 4294964992  ;;  %s17_s20 = sadd.s32 1, %s792_s20   ;;  %s979_s15 = smov %s776_s16 }
  0xbf   : > { %p14_p10 = scmp.ge.s32.totalorder %s17_s20, 4   ;;  %s980_s16 = smov %s780_s17 }
  0xc0   : > { %s981_s17 = smov %s876_s28  ;;  %s982_s18 = smov %s788_s19 }
  0xc1   : > { %s983_s19 = smov %s985_s23  ;;  %16 = sbr.rel (!%p14_p10) target bundleno = 4 (0x4), region = 88 }
  0xc6   :  { %495 = vsyncpa [#allocation3], 1 }
  0xc7   :  { %497 = vsyncpa [#allocation3 + $0x1], 1 }

</bundles_post_ra>
